<compile_context>
chip_gen: v7x
topology: tpu7x:2x2x1
jax: 0.10.0
libtpu: 0.0.40
codegen_flags: <defaults>
</compile_context>

<pallas_src>
import functools

import jax
import jax.numpy as jnp
from jax.experimental import pallas as pl
from jax.experimental.pallas import tpu as pltpu


def _round_up(x, m):
    return ((x + m - 1) // m) * m


# ----------------------------------------------------------------------------
# Kernel
# ----------------------------------------------------------------------------
def ac_kernel(x_ref, w_ref, b_ref, out_ref, *, e_pad, n_act, compute_dtype):
    """Fused actor/critic MLP on one (TB, e_pad) batch tile.

    w_ref rows: [0, e_pad)              -> W1   (E, 128)  = [aw1 | cw1]
                [e_pad, e_pad+128)      -> W2   (128,128)  = blkdiag(aw2, cw2)
                [e_pad+128, e_pad+256)  -> W3   (128,128)  = blkdiag(aw3, I64)
                [e_pad+256, e_pad+384)  -> W4   (128,128)  = blkdiag(aw4_pad, cw3_pad)
    b_ref rows 0..3 = biases for the four stages (f32).
    out lanes [0, n_act) = log-probs, lane 64 = value.
    """
    x = x_ref[...].astype(compute_dtype)
    b = b_ref[...]  # (8, 128) f32

    w1 = w_ref[0:e_pad, :]
    w2 = w_ref[e_pad:e_pad + 128, :]
    w3 = w_ref[e_pad + 128:e_pad + 256, :]
    w4 = w_ref[e_pad + 256:e_pad + 384, :]

    # (1, 128) lane masks, broadcast against (TB, 128) activations.
    lane = jax.lax.broadcasted_iota(jnp.int32, (1, 128), 1)
    actor_half = lane < 64          # actor occupies lanes [0, 64)
    actor_lanes = lane < n_act      # real (unpadded) logits

    # Stage 1: actor L1 (ReLU) + critic L1 (Tanh) in one 128-wide matmul.
    z = jnp.dot(x, w1, preferred_element_type=jnp.float32) + b[0:1, :]
    h = jnp.where(actor_half, jnp.maximum(z, 0.0), jnp.tanh(z))

    # Stage 2: actor L2 (ReLU) + critic L2 (Tanh), block-diagonal.
    z = jnp.dot(h.astype(compute_dtype), w2,
                preferred_element_type=jnp.float32) + b[1:2, :]
    h = jnp.where(actor_half, jnp.maximum(z, 0.0), jnp.tanh(z))

    # Stage 3: actor L3 (ReLU); critic half passes through an identity block.
    z = jnp.dot(h.astype(compute_dtype), w3,
                preferred_element_type=jnp.float32) + b[2:3, :]
    h = jnp.where(actor_half, jnp.maximum(z, 0.0), z)

    # Stage 4: actor logits head + critic value head, block-diagonal.
    s = jnp.dot(h.astype(compute_dtype), w4,
                preferred_element_type=jnp.float32) + b[3:4, :]

    # log-softmax over the real action lanes only (Categorical log-probs).
    neg = jnp.float32(-1e30)
    logits = jnp.where(actor_lanes, s, neg)
    m = jnp.max(logits, axis=-1, keepdims=True)
    zc = logits - m
    lse = jnp.log(jnp.sum(jnp.exp(zc), axis=-1, keepdims=True))

    # Lane-dense store: log-probs in actor lanes, raw s elsewhere (value @ 64).
    out_ref[...] = jnp.where(actor_lanes, zc - lse, s)


# ----------------------------------------------------------------------------
# Parameter init (replicates PyTorch init_params) and packing
# ----------------------------------------------------------------------------
def make_linear(key, in_dim, out_dim):
    """W ~ N(0,1), row-normalized per output row, b = 0 (as in init_params)."""
    w = jax.random.normal(key, (out_dim, in_dim), dtype=jnp.float32)
    w = w * (1.0 / jnp.sqrt(jnp.sum(w * w, axis=1, keepdims=True)))
    b = jnp.zeros((1, out_dim), dtype=jnp.float32)
    return w.T, b  # stored as [in, out] for x @ W


def init_model_params(key, embedding_size, n_actions):
    ks = jax.random.split(key, 7)
    actor = [
        make_linear(ks[0], embedding_size, 64),
        make_linear(ks[1], 64, 64),
        make_linear(ks[2], 64, 64),
        make_linear(ks[3], 64, n_actions),
    ]
    critic = [
        make_linear(ks[4], embedding_size, 64),
        make_linear(ks[5], 64, 64),
        make_linear(ks[6], 64, 1),
    ]
    return {"actor": actor, "critic": critic}


def pack_params(params, e_pad, compute_dtype):
    """Pack the 14 per-layer tensors into one weight slab + one bias slab."""
    (aw1, ab1), (aw2, ab2), (aw3, ab3), (aw4, ab4) = params["actor"]
    (cw1, cb1), (cw2, cb2), (cw3, cb3) = params["critic"]
    E = aw1.shape[0]
    n_act = aw4.shape[1]
    assert n_act <= 64, "fused layout assumes n_actions <= 64"

    # Stage 1: [aw1 | cw1], padded to e_pad input rows.
    w1 = jnp.zeros((e_pad, 128), jnp.float32)
    w1 = w1.at[:E, :64].set(aw1).at[:E, 64:].set(cw1)

    def blkdiag(a, c):
        w = jnp.zeros((128, 128), jnp.float32)
        w = w.at[:64, :a.shape[1]].set(a)
        w = w.at[64:, 64:64 + c.shape[1]].set(c)
        return w

    w2 = blkdiag(aw2, cw2)
    w3 = blkdiag(aw3, jnp.eye(64, dtype=jnp.float32))   # critic pass-through
    w4 = blkdiag(aw4, cw3)                               # value lands on lane 64

    w_slab = jnp.concatenate([w1, w2, w3, w4], axis=0).astype(compute_dtype)

    b_slab = jnp.zeros((8, 128), jnp.float32)
    b_slab = b_slab.at[0, :64].set(ab1[0]).at[0, 64:].set(cb1[0])
    b_slab = b_slab.at[1, :64].set(ab2[0]).at[1, 64:].set(cb2[0])
    b_slab = b_slab.at[2, :64].set(ab3[0])
    b_slab = b_slab.at[3, :n_act].set(ab4[0]).at[3, 64].set(cb3[0, 0])
    return w_slab, b_slab, n_act


# ----------------------------------------------------------------------------
# Forward wrapper
# ----------------------------------------------------------------------------
def basic_ac_forward(env_feat, text_feat, params, *, tb=256,
                     compute_dtype=jnp.bfloat16):
    # embedding = cat((env_model(obs), obs.text), dim=-1)   (plain-JAX glue)
    emb = jnp.concatenate([env_feat, text_feat], axis=-1).astype(jnp.float32)
    B, E = emb.shape
    e_pad = _round_up(E, 8)

    # Batch tile: multiple of 16 (bf16 sublane packing; also a multiple of 8
    # for f32), <= 1024 (default scoped-VMEM safe on v5e), clamped to the
    # padded batch so tiny batches don't over-pad.
    tb = int(min(max(tb, 16), 1024))
    tb = _round_up(tb, 16)
    tb = min(tb, _round_up(B, 16))
    b_pad = _round_up(B, tb)
    grid = b_pad // tb

    # In production these would be packed once, not per call.
    w_slab, b_slab, n_act = pack_params(params, e_pad, compute_dtype)

    emb_pad = jnp.zeros((b_pad, e_pad), compute_dtype).at[:B, :E].set(
        emb.astype(compute_dtype))

    itemsize = jnp.dtype(compute_dtype).itemsize
    cost = pl.CostEstimate(
        flops=int(2 * b_pad * (e_pad * 128 + 3 * 128 * 128)),
        transcendentals=int(b_pad * (3 * 128 + 1)),
        bytes_accessed=int(b_pad * e_pad * itemsize + w_slab.size * itemsize
                           + b_slab.size * 4 + b_pad * 128 * 4),
    )

    kernel = functools.partial(ac_kernel, e_pad=e_pad, n_act=n_act,
                               compute_dtype=compute_dtype)

    out = pl.pallas_call(
        kernel,
        out_shape=jax.ShapeDtypeStruct((b_pad, 128), jnp.float32),
        grid_spec=pltpu.PrefetchScalarGridSpec(
            num_scalar_prefetch=0,
            grid=(grid,),
            in_specs=[
                pl.BlockSpec((tb, e_pad), lambda i: (i, 0)),
                pl.BlockSpec(w_slab.shape, lambda i: (0, 0)),  # resident slab
                pl.BlockSpec(b_slab.shape, lambda i: (0, 0)),
            ],
            out_specs=pl.BlockSpec((tb, 128), lambda i: (i, 0)),
        ),
        compiler_params=pltpu.CompilerParams(
            dimension_semantics=("parallel",)),
        cost_estimate=cost,
    )(emb_pad, w_slab, b_slab)

    log_probs = out[:B, :n_act]   # Categorical log-probs
    value = out[:B, 64]           # x.squeeze(1)
    return log_probs, value


# ----------------------------------------------------------------------------
# Pure-JAX reference (unfused, f32) for correctness checking
# ----------------------------------------------------------------------------
def reference_forward(emb, params):
    (aw1, ab1), (aw2, ab2), (aw3, ab3), (aw4, ab4) = params["actor"]
    (cw1, cb1), (cw2, cb2), (cw3, cb3) = params["critic"]
    p = jax.lax.Precision.HIGHEST
    h = jnp.maximum(jnp.dot(emb, aw1, precision=p) + ab1, 0.0)
    h = jnp.maximum(jnp.dot(h, aw2, precision=p) + ab2, 0.0)
    h = jnp.maximum(jnp.dot(h, aw3, precision=p) + ab3, 0.0)
    logits = jnp.dot(h, aw4, precision=p) + ab4
    logp = jax.nn.log_softmax(logits, axis=-1)
    c = jnp.tanh(jnp.dot(emb, cw1, precision=p) + cb1)
    c = jnp.tanh(jnp.dot(c, cw2, precision=p) + cb2)
    value = (jnp.dot(c, cw3, precision=p) + cb3)[:, 0]
    return logp, value


if __name__ == "__main__":
    key = jax.random.PRNGKey(0)
    B = 50          # deliberately NOT a multiple of the tile -> exercises padding
    ENV_EMB = 32    # env_model embedding size
    D_OUT = 32      # args.d_out (obs.text feature size)
    N_ACT = 7       # action_space.n

    k_env, k_text, k_p = jax.random.split(key, 3)
    env_feat = jax.random.normal(k_env, (B, ENV_EMB), dtype=jnp.float32)
    text_feat = jax.random.normal(k_text, (B, D_OUT), dtype=jnp.float32)
    params = init_model_params(k_p, ENV_EMB + D_OUT, N_ACT)

    emb = jnp.concatenate([env_feat, text_feat], axis=-1)
    ref_logp, ref_val = reference_forward(emb, params)

    # f32 path (tb=32 -> grid of 2 steps, also the v7x 2-TC case).
    logp, value = basic_ac_forward(env_feat, text_feat, params, tb=32,
                                   compute_dtype=jnp.float32)
    jax.block_until_ready((logp, value))
    assert logp.shape == (B, N_ACT) and value.shape == (B,)
    assert jnp.allclose(logp, ref_logp, atol=5e-2, rtol=2e-2)
    assert jnp.allclose(value, ref_val, atol=5e-2, rtol=2e-2)

    # bf16 MXU path (v6e/v7x recommendation) with f32 accumulation.
    logp_bf, value_bf = basic_ac_forward(env_feat, text_feat, params, tb=32,
                                         compute_dtype=jnp.bfloat16)
    jax.block_until_ready((logp_bf, value_bf))
    assert logp_bf.shape == (B, N_ACT) and value_bf.shape == (B,)
    assert bool(jnp.all(jnp.isfinite(logp_bf))) and bool(jnp.all(jnp.isfinite(value_bf)))
    assert jnp.allclose(logp_bf, ref_logp, atol=0.3, rtol=0.1)

    print("KERNEL_OK")
</pallas_src>

<mosaic_0001>
module attributes {stable_mosaic.version = 11 : i64} {
  func.func @ac_kernel(%arg0: i32, %arg1: memref<32x64xf32, #tpu.memory_space<vmem>>, %arg2: memref<448x128xf32, #tpu.memory_space<vmem>>, %arg3: memref<8x128xf32, #tpu.memory_space<vmem>>, %arg4: memref<32x128xf32, #tpu.memory_space<vmem>>) attributes {dimension_semantics = [#tpu.dimension_semantics<parallel>], iteration_bounds = array<i64: 2>, scalar_prefetch = 0 : i64, scratch_operands = 0 : i64, tpu.core_type = #tpu.core_type<tc>, window_params = [{transform_indices = @transform_0, window_bounds = array<i64: 32, 64>}, {pipeline_mode = #tpu.pipeline_mode<synchronous>, transform_indices = @transform_1, window_bounds = array<i64: 448, 128>}, {pipeline_mode = #tpu.pipeline_mode<synchronous>, transform_indices = @transform_2, window_bounds = array<i64: 8, 128>}, {transform_indices = @transform_3, window_bounds = array<i64: 32, 128>}]} {
    %c0 = arith.constant 0 : index
    %c0_0 = arith.constant 0 : index
    %0 = vector.load %arg1[%c0, %c0_0] : memref<32x64xf32, #tpu.memory_space<vmem>>, vector<32x64xf32>
    %c0_1 = arith.constant 0 : index
    %c0_2 = arith.constant 0 : index
    %1 = vector.load %arg3[%c0_1, %c0_2] : memref<8x128xf32, #tpu.memory_space<vmem>>, vector<8x128xf32>
    %c0_3 = arith.constant 0 : index
    %c0_4 = arith.constant 0 : index
    %2 = vector.load %arg2[%c0_3, %c0_4] : memref<448x128xf32, #tpu.memory_space<vmem>>, vector<64x128xf32>
    %c64 = arith.constant 64 : index
    %c0_5 = arith.constant 0 : index
    %3 = vector.load %arg2[%c64, %c0_5] : memref<448x128xf32, #tpu.memory_space<vmem>>, vector<128x128xf32>
    %c192 = arith.constant 192 : index
    %c0_6 = arith.constant 0 : index
    %4 = vector.load %arg2[%c192, %c0_6] : memref<448x128xf32, #tpu.memory_space<vmem>>, vector<128x128xf32>
    %c320 = arith.constant 320 : index
    %c0_7 = arith.constant 0 : index
    %5 = vector.load %arg2[%c320, %c0_7] : memref<448x128xf32, #tpu.memory_space<vmem>>, vector<128x128xf32>
    %6 = tpu.iota {dimensions = array<i32: 1>} : vector<1x128xi32>
    %c64_i32 = arith.constant 64 : i32
    %7 = vector.broadcast %c64_i32 : i32 to vector<1x128xi32>
    %8 = arith.cmpi slt, %6, %7 : vector<1x128xi32>
    %c7_i32 = arith.constant 7 : i32
    %9 = vector.broadcast %c7_i32 : i32 to vector<1x128xi32>
    %10 = arith.cmpi slt, %6, %9 : vector<1x128xi32>
    %cst = arith.constant dense<0.000000e+00> : vector<32x128xf32>
    %11 = tpu.matmul %0, %2, %cst {dimension_numbers = #tpu.dot_dimension_numbers<[1], [0], [0], [1], [0, 0, 1, 1], [], []>} : vector<32x64xf32>, vector<64x128xf32>, vector<32x128xf32> -> vector<32x128xf32>
    %12 = vector.extract_strided_slice %1 {offsets = [0, 0], sizes = [1, 128], strides = [1, 1]} : vector<8x128xf32> to vector<1x128xf32>
    %13 = vector.broadcast %12 : vector<1x128xf32> to vector<32x128xf32>
    %14 = arith.addf %11, %13 : vector<32x128xf32>
    %cst_8 = arith.constant 0.000000e+00 : f32
    %15 = vector.broadcast %cst_8 : f32 to vector<32x128xf32>
    %16 = arith.maximumf %14, %15 : vector<32x128xf32>
    %17 = math.tanh %14 : vector<32x128xf32>
    %18 = vector.shape_cast %8 : vector<1x128xi1> to vector<1x128xi1>
    %19 = vector.broadcast %18 : vector<1x128xi1> to vector<32x128xi1>
    %20 = arith.select %19, %16, %17 : vector<32x128xi1>, vector<32x128xf32>
    %cst_9 = arith.constant dense<0.000000e+00> : vector<32x128xf32>
    %21 = tpu.matmul %20, %3, %cst_9 {dimension_numbers = #tpu.dot_dimension_numbers<[1], [0], [0], [1], [0, 0, 1, 1], [], []>} : vector<32x128xf32>, vector<128x128xf32>, vector<32x128xf32> -> vector<32x128xf32>
    %22 = vector.extract_strided_slice %1 {offsets = [1, 0], sizes = [1, 128], strides = [1, 1]} : vector<8x128xf32> to vector<1x128xf32>
    %23 = vector.broadcast %22 : vector<1x128xf32> to vector<32x128xf32>
    %24 = arith.addf %21, %23 : vector<32x128xf32>
    %cst_10 = arith.constant 0.000000e+00 : f32
    %25 = vector.broadcast %cst_10 : f32 to vector<32x128xf32>
    %26 = arith.maximumf %24, %25 : vector<32x128xf32>
    %27 = math.tanh %24 : vector<32x128xf32>
    %28 = vector.shape_cast %8 : vector<1x128xi1> to vector<1x128xi1>
    %29 = vector.broadcast %28 : vector<1x128xi1> to vector<32x128xi1>
    %30 = arith.select %29, %26, %27 : vector<32x128xi1>, vector<32x128xf32>
    %cst_11 = arith.constant dense<0.000000e+00> : vector<32x128xf32>
    %31 = tpu.matmul %30, %4, %cst_11 {dimension_numbers = #tpu.dot_dimension_numbers<[1], [0], [0], [1], [0, 0, 1, 1], [], []>} : vector<32x128xf32>, vector<128x128xf32>, vector<32x128xf32> -> vector<32x128xf32>
    %32 = vector.extract_strided_slice %1 {offsets = [2, 0], sizes = [1, 128], strides = [1, 1]} : vector<8x128xf32> to vector<1x128xf32>
    %33 = vector.broadcast %32 : vector<1x128xf32> to vector<32x128xf32>
    %34 = arith.addf %31, %33 : vector<32x128xf32>
    %cst_12 = arith.constant 0.000000e+00 : f32
    %35 = vector.broadcast %cst_12 : f32 to vector<32x128xf32>
    %36 = arith.maximumf %34, %35 : vector<32x128xf32>
    %37 = vector.shape_cast %8 : vector<1x128xi1> to vector<1x128xi1>
    %38 = vector.broadcast %37 : vector<1x128xi1> to vector<32x128xi1>
    %39 = arith.select %38, %36, %34 : vector<32x128xi1>, vector<32x128xf32>
    %cst_13 = arith.constant dense<0.000000e+00> : vector<32x128xf32>
    %40 = tpu.matmul %39, %5, %cst_13 {dimension_numbers = #tpu.dot_dimension_numbers<[1], [0], [0], [1], [0, 0, 1, 1], [], []>} : vector<32x128xf32>, vector<128x128xf32>, vector<32x128xf32> -> vector<32x128xf32>
    %41 = vector.extract_strided_slice %1 {offsets = [3, 0], sizes = [1, 128], strides = [1, 1]} : vector<8x128xf32> to vector<1x128xf32>
    %42 = vector.broadcast %41 : vector<1x128xf32> to vector<32x128xf32>
    %43 = arith.addf %40, %42 : vector<32x128xf32>
    %cst_14 = arith.constant -1.000000e+30 : f32
    %44 = vector.shape_cast %10 : vector<1x128xi1> to vector<1x128xi1>
    %45 = vector.broadcast %44 : vector<1x128xi1> to vector<32x128xi1>
    %46 = vector.broadcast %cst_14 : f32 to vector<32x128xf32>
    %47 = arith.select %45, %43, %46 : vector<32x128xi1>, vector<32x128xf32>
    %cst_15 = arith.constant dense<0xFF800000> : vector<32xf32>
    %48 = vector.multi_reduction <maximumf>, %47, %cst_15 [1] : vector<32x128xf32> to vector<32xf32>
    %49 = vector.shape_cast %48 : vector<32xf32> to vector<32x1xf32>
    %50 = vector.broadcast %49 : vector<32x1xf32> to vector<32x128xf32>
    %51 = arith.subf %47, %50 : vector<32x128xf32>
    %52 = math.exp %51 : vector<32x128xf32>
    %cst_16 = arith.constant dense<0.000000e+00> : vector<32xf32>
    %53 = vector.multi_reduction <add>, %52, %cst_16 [1] : vector<32x128xf32> to vector<32xf32>
    %54 = vector.shape_cast %53 : vector<32xf32> to vector<32x1xf32>
    %55 = math.log %54 : vector<32x1xf32>
    %56 = vector.broadcast %55 : vector<32x1xf32> to vector<32x128xf32>
    %57 = arith.subf %51, %56 : vector<32x128xf32>
    %58 = vector.shape_cast %10 : vector<1x128xi1> to vector<1x128xi1>
    %59 = vector.broadcast %58 : vector<1x128xi1> to vector<32x128xi1>
    %60 = arith.select %59, %57, %43 : vector<32x128xi1>, vector<32x128xf32>
    %c0_17 = arith.constant 0 : index
    %c0_18 = arith.constant 0 : index
    %61 = vector.load %arg4[%c0_17, %c0_18] : memref<32x128xf32, #tpu.memory_space<vmem>>, vector<32x128xf32>
    tpu.vector_store %arg4[%c0_17, %c0_18], %60 {strides = array<i32>} : memref<32x128xf32, #tpu.memory_space<vmem>>, vector<32x128xf32>,
    return
  }
  func.func @transform_0(%arg0: i32) -> (i32, i32) {
    %c0_i32 = arith.constant 0 : i32
    %c0_i32_0 = arith.constant 0 : i32
    return %arg0, %c0_i32 : i32, i32
  }
  func.func @transform_1(%arg0: i32) -> (i32, i32) {
    %c0_i32 = arith.constant 0 : i32
    %c0_i32_0 = arith.constant 0 : i32
    %c0_i32_1 = arith.constant 0 : i32
    return %c0_i32, %c0_i32_0 : i32, i32
  }
  func.func @transform_2(%arg0: i32) -> (i32, i32) {
    %c0_i32 = arith.constant 0 : i32
    %c0_i32_0 = arith.constant 0 : i32
    %c0_i32_1 = arith.constant 0 : i32
    return %c0_i32, %c0_i32_0 : i32, i32
  }
  func.func @transform_3(%arg0: i32) -> (i32, i32) {
    %c0_i32 = arith.constant 0 : i32
    %c0_i32_0 = arith.constant 0 : i32
    return %arg0, %c0_i32 : i32, i32
  }
}

</mosaic_0001>

<bundles_post_ra>
// kernel: tpu_custom_call.1
= control target key start
LH: loop header
LB: loop body
LE: loop exit
PB: predicated region body
PF: predicated region fallthrough
CT: control target
= control target key end

     0   :  { %8 = vsyncpa [#allocation3], 0  ;;  %s1793_s0 = inlined_call_operand.hbm [shape: f32[64,64], index: 0, kind: input, shape index: {}]   ;;  %s1794_s1 = inlined_call_operand.hbm [shape: f32[448,128], index: 1, kind: input, shape index: {}]   ;;  %s1795_s2 = inlined_call_operand.hbm [shape: f32[8,128], index: 2, kind: input, shape index: {}]   ;;  %s1796_s3 = inlined_call_operand.hbm [shape: f32[64,128], index: 3, kind: output, shape index: {}]  }
   0x1   :  { %10 = vsyncpa [#allocation3 + $0x1], 0 }
   0x2   :  { %11 = vsyncpa [#allocation6], 0 }
   0x3   :  { %12 = vsyncpa [#allocation4], 0 }
   0x4   :  { %14 = vsyncpa [#allocation4 + $0x1], 0  ;;  %s1479_s12 = smov 0   ;;  %s1481_s13 = smov 0  }
   0x5   :  { %s1483_s14 = smov 0   ;;  %s1485_s15 = smov 0  }
   0x6 LB: > { %s1500_s16 = sadd.s32 4294967295, %s1449_s15   ;;  %s846_s17 = sadd.s32 4294967294, %s1449_s15   ;;  %s1449_s15 = sphi %s1485_s15, %s1816_s15   ;;  %s1445_s14 = sphi %s1483_s14, %s1815_s14   ;;  %s1441_s13 = sphi %s1481_s13, %s1814_s13   ;;  %s1437_s12 = sphi %s1479_s12, %s1813_s12  }
   0x7   : > { %p40_p0 = scmp.ne.s32.totalorder %s1441_s13, %s1437_s12  ;;  %p1797_p1 = scmp.eq.s32.totalorder %s1500_s16, 0 }
   0x8   : > { %p112_p3 = scmp.eq.s32.totalorder %s846_s17, 1  ;;  %p847_p5 = scmp.ge.s32.totalorder %s1449_s15, 1 }
   0x9   : > { %p1509_p4 = por %p1797_p1, %p40_p0  ;;  %p119_p7 = scmp.lt.s32.totalorder %s1449_s15, 3 }
   0xa   : > { %p1514_p6 = por %p112_p3, %p40_p0  ;;  %s1451_s21 = smov [#allocation5]  }
   0xb   : > { %s1800_s18 = scalar_select %p1509_p4, 1, 0 }
   0xc   : > { %s1801_s19 = scalar_select %p1514_p6, 1, 0 }
   0xd   : > { %p1519_p8 = pnand %p847_p5, %p119_p7  ;;  %s131_s22 = sshll.u32 %s1451_s21, 4  ;;  %s1523_s22 = int_to_ptr.vmem [resolvable:$true] %s131_s22 }
   0xe   : > { %s1452_s24 = smov [#allocation7]   ;;  %s1293_s28 = scalar_lea.hbm %s1794_s1, 7168 }
   0xf   : > { %p1202_p9 = pneg %p1519_p8  ;;  %s145_s25 = sshll.u32 %s1452_s24, 4  ;;  %s1534_s25 = int_to_ptr.vmem [resolvable:$true] %s145_s25 }
  0x10   : > { %p1294_p12 = scmp.ne.s32.totalorder %s1794_s1, %s1293_s28  ;;  %p1300_p5 = scmp.lt.u32.totalorder %s1293_s28, %s1794_s1 }
  0x11   : > { %p1530_p11 = pnand %p1202_p9, %p1797_p1 }
  0x13   : > { %p1295_p13 = pneg %p1530_p11 }
  0x15   : > { %p1296_p0 = pnand %p1295_p13, %p1294_p12 }
  0x17   : > { %p1297_p3 = pneg %p1296_p0 }
  0x19   : > { %p1302_p7 = pnand %p1300_p5, %p1297_p3 }
  0x1b   : > { %1305 = shalt.err (!%p1302_p7)
}
  0x1c   : > { %s1306_s6 = scalar_lea.vmem %s1523_s22, 7168  ;;  %p1314_p2 = scmp.lt.s32.totalorder %s1523_s22, %s1523_s22 }
  0x1d   : > { %p1307_p9 = scmp.ne.s32.totalorder %s1523_s22, %s1306_s6  ;;  %p1315_p12 = scmp.lt.s32.totalorder %s1306_s6, %s1306_s6 }
  0x1f   : > { %p1309_p10 = pnand %p1307_p9, %p1295_p13  ;;  %p1316_p0 = por %p1315_p12, %p1314_p2 }
  0x21   : > { %p1310_p1 = pneg %p1309_p10 }
  0x23   : > { %p1317_p6 = pnand %p1316_p0, %p1310_p1 }
  0x25   : > { %1320 = shalt.err (!%p1317_p6)
}
  0x26   : > { %s1453_s7 = smov 128   ;;  %s1454_s8 = smov 8  }
  0x27   : > { %1205 = dma.hbm_to_vmem [thread:$0]  (!%p1530_p11), %s1794_s1, 7168, %s1523_s22, [#allocation6], %s1453_s7, %s1453_s7, %s1454_s8  }
  0x28   : > { %s1321_s21 = scalar_lea.hbm %s1795_s2, 128 }
  0x29   : > { %p1322_p1 = scmp.ne.s32.totalorder %s1795_s2, %s1321_s21  ;;  %p1328_p10 = scmp.lt.u32.totalorder %s1321_s21, %s1795_s2 }
  0x2b   : > { %p1324_p2 = pnand %p1322_p1, %p1295_p13 }
  0x2d   : > { %p1325_p6 = pneg %p1324_p2 }
  0x2f   : > { %p1330_p3 = pnand %p1328_p10, %p1325_p6 }
  0x31   : > { %1333 = shalt.err (!%p1330_p3)
}
  0x32   : > { %s1334_s22 = scalar_lea.vmem %s1534_s25, 128  ;;  %p1342_p12 = scmp.lt.s32.totalorder %s1534_s25, %s1534_s25 }
  0x33   : > { %p1335_p5 = scmp.ne.s32.totalorder %s1534_s25, %s1334_s22  ;;  %p1343_p0 = scmp.lt.s32.totalorder %s1334_s22, %s1334_s22 }
  0x35   : > { %p1337_p7 = pnand %p1335_p5, %p1295_p13  ;;  %p1344_p1 = por %p1343_p0, %p1342_p12 }
  0x37   : > { %p1338_p9 = pneg %p1337_p7 }
  0x39   : > { %p1345_p2 = pnand %p1344_p1, %p1338_p9 }
  0x3b   : > { %1348 = shalt.err (!%p1345_p2)
}
  0x3c   : > { %1208 = dma.hbm_to_vmem [thread:$0]  (!%p1530_p11), %s1795_s2, 128, %s1534_s25, [#allocation6]  }
  0x3d   : > { %s1592_s4 = sadd.s32 1, %s1449_s15   ;;  %s27_s23 = sadd.s32 1, %s1445_s14 }
  0x3e   : > { %s24_s5 = ssub.s32 %s1449_s15, %s1592_s4  ;;  %p34_p13 = scmp.ne.s32.totalorder %s1445_s14, %s1441_s13 }
  0x3f   : > { %p25_p6 = scmp.eq.s32.totalorder %s24_s5, 0  ;;  %p35_p10 = scmp.eq.s32.totalorder %s1449_s15, 0 }
  0x40   : > { %p1804_p3 = scmp.eq.s32.totalorder %s1500_s16, 1  ;;  %p1219_p7 = scmp.lt.s32.totalorder %s1449_s15, 2 }
  0x41   : > { %s1608_s9 = scalar_select %p25_p6, %s1445_s14, %s27_s23  }
  0x42   : > { %p1602_p5 = por %p1804_p3, %p34_p13  ;;  %p36_p9 = por %p35_p10, %p34_p13 }
  0x43   : > { %s156_s10 = sand.u32 1, %s1445_s14   ;;  %s868_s25 = sshll.u32 %s1449_s15, 9 }
  0x44   : > { %s1805_s6 = scalar_select %p1602_p5, 1, 0 }
  0x45   : > { %s851_s11 = sshll.u32 %s156_s10, 5  ;;  %s1615_s24 = scalar_lea.hbm %s1793_s0, %s868_s25 }
  0x46   : > { %s160_s26 = scalar_lea.vmem [#allocation2], %s851_s11  ;;  %p1619_p11 = pnand %p1219_p7, %p36_p9 }
  0x47   : > { %s167_s27 = sshll.u32 %s160_s26, 4  ;;  %s1623_s22 = scalar_lea.sflag [#allocation3], %s156_s10  ;;  %s1617_s27 = int_to_ptr.vmem [resolvable:$true] %s167_s27 }
  0x48   : > { %s1349_s29 = scalar_lea.hbm %s1615_s24, 512  ;;  %p1351_p0 = pneg %p1619_p11 }
  0x49   : > { %p1350_p12 = scmp.ne.s32.totalorder %s1615_s24, %s1349_s29  ;;  %s1354_s5 = scalar_lea.hbm %s1793_s0, 1024 }
  0x4a   : > { %p1355_p13 = scmp.lt.u32.totalorder %s1615_s24, %s1793_s0  ;;  %p1356_p6 = scmp.lt.u32.totalorder %s1354_s5, %s1349_s29 }
  0x4b   : > { %p1352_p1 = pnand %p1351_p0, %p1350_p12  ;;  %p1358_p3 = scmp.lt.u32.totalorder %s1349_s29, %s1615_s24 }
  0x4c   : > { %p1357_p10 = por %p1356_p6, %p1355_p13 }
  0x4d   : > { %p1353_p2 = pneg %p1352_p1 }
  0x4e   : > { %p1359_p7 = por %p1358_p3, %p1357_p10 }
  0x50   : > { %p1360_p9 = pnand %p1359_p7, %p1353_p2 }
  0x52   : > { %1363 = shalt.err (!%p1360_p9)
}
  0x53   : > { %s1364_s10 = scalar_lea.vmem %s1617_s27, 512  ;;  %s1455_s17 = smov [#allocation2]  }
  0x54   : > { %p1365_p12 = scmp.ne.s32.totalorder %s1617_s27, %s1364_s10  ;;  %s1369_s21 = sshll.u32 %s1455_s17, 4  ;;  %s1370_s21 = int_to_ptr.vmem [resolvable:$false] %s1369_s21 }
  0x55   : > { %s1371_s26 = scalar_lea.vmem %s1370_s21, 1024  ;;  %p1372_p4 = scmp.lt.s32.totalorder %s1617_s27, %s1370_s21 }
  0x56   : > { %p1367_p1 = pnand %p1365_p12, %p1351_p0  ;;  %p1373_p13 = scmp.lt.s32.totalorder %s1371_s26, %s1364_s10 }
  0x58   : > { %p1368_p5 = pneg %p1367_p1  ;;  %p1374_p6 = por %p1373_p13, %p1372_p4 }
  0x5a   : > { %p1375_p10 = pnand %p1374_p6, %p1368_p5 }
  0x5c   : > { %1378 = shalt.err (!%p1375_p10)
}
  0x5d   : > { %1212 = dma.hbm_to_vmem [thread:$0]  (!%p1619_p11), %s1615_s24, 512, %s1617_s27, %s1623_s22, %s1453_s7, %s1453_s7, %s1454_s8  }
  0x5e   : > { %179 = sbr.rel (%p1519_p8) target bundleno = 1354 (0x54a), region = 32  ;;  %s1657_s29 = sand.u32 (!%p1519_p8), 1, %s1441_s13  }
  0x5f   : > { %s855_s30 = sshll.u32 (!%p1519_p8), %s1657_s29, 5  ;;  %s182_s23 = scalar_lea.sflag (!%p1519_p8), [#allocation3], %s1657_s29 }
  0x60   : > { %s1663_s28 = scalar_lea.vmem (!%p1519_p8), [#allocation2], %s855_s30  ;;  %p1807_p4 = scmp.ne.s32.totalorder (!%p1519_p8), %s1800_s18, 0 }
  0x65   : > { %1424 = dma.done.wait (%p1807_p4), %s182_s23, 512  }
  0x66   : > { %1426 = vsyncadd (%p1807_p4), %s182_s23, 4294966784  ;;  %p1808_p5 = scmp.eq.s32.totalorder %s1500_s16, 0 }
  0x68   : > { %1428 = dma.done.wait (%p1808_p5), [#allocation6], 7296   ;;  %p1809_p8 = pmov %p1808_p5 }
  0x69   : > { %v223_v0 = vld [vmem:[#allocation5] sm:$0xff]  ;;  %v224_v1 = vld [vmem:[#allocation5 + $0x8] sm:$0xff]  ;;  %v225_v2 = vld [vmem:[#allocation5 + $0x10] sm:$0xff]  ;;  %vm287_vm0 = vcmask 523264   ;;  %v279_v52 = vlaneseq  ;;  %s215_s18 = scalar_lea.vmem [#allocation8], %s855_s30  ;;  %s869_s7 = sshll.u32 %s1500_s16, 9 }
  0x6a   : > { %1430 = vsyncadd (%p1809_p8), [#allocation6], 4294960000  ;;  %v1078_v3 = vpack.c.bf16 %v224_v1, %v223_v0  ;;  %v226_v4 = vld [vmem:[#allocation5 + $0x18] sm:$0xff]  ;;  %v227_v6 = vld [vmem:[#allocation5 + $0x20] sm:$0xff]  ;;  %s754_s20 = sshll.u32 %s215_s18, 4  ;;  %s1744_s27 = scalar_lea.hbm %s1796_s3, %s869_s7  ;;  %s1746_s20 = int_to_ptr.vmem [resolvable:$true] %s754_s20 }
  0x6b   : > { %v1082_v5 = vpack.c.bf16 %v226_v4, %v225_v2  ;;  %v228_v7 = vld [vmem:[#allocation5 + $0x28] sm:$0xff]  ;;  %v218_v8 = vld [vmem:[%s1663_s28] sm:$0xff]  ;;  %v233_v11 = vld [vmem:[#allocation5 + $0x50] sm:$0xff]  ;;  %v1681_v53 = vshrl.u32 %v279_v52, 7  ;;  %v1687_v1 = vand.u32 127, %v279_v52  ;;  %s741_s16 = scalar_lea.sflag [#allocation4], %s1657_s29 }
  0x6c   : > { %1079 = vmatprep.subr.bf16.mxu0 %v1078_v3  ;;  %958 = vmatprep.mubr.msk.f32.mxu0 %vm287_vm0, %v218_v8  ;;  %v231_v9 = vld [vmem:[#allocation5 + $0x40] sm:$0xff]  ;;  %v232_v10 = vld [vmem:[#allocation5 + $0x48] sm:$0xff]  ;;  %v1086_v12 = vpack.c.bf16 %v228_v7, %v227_v6  ;;  %v229_v13 = vld [vmem:[#allocation5 + $0x30] sm:$0xff]  ;;  %s1379_s22 = scalar_lea.vmem %s1746_s20, 512  ;;  %p1810_p0 = scmp.ne.s32.totalorder %s1805_s6, 0 }
  0x6d   : > { %1081 = vmatpush3.bf16.msra.mxu0 %v1078_v3  ;;  %v1094_v14 = vpack.c.bf16 %v232_v10, %v231_v9  ;;  %v234_v15 = vld [vmem:[#allocation5 + $0x58] sm:$0xff]  ;;  %v235_v18 = vld [vmem:[#allocation5 + $0x60] sm:$0xff]  ;;  %v236_v19 = vld [vmem:[#allocation5 + $0x68] sm:$0xff]  ;;  %v285_v54 = vsub.s32 0, %v1681_v53  ;;  %vm281_vm1 = vcmp.lt.s32.totalorder %v1687_v1, 64  ;;  %vm282_vm2 = vcmp.lt.s32.totalorder %v1687_v1, 7  ;;  %p1380_p11 = scmp.ne.s32.totalorder %s1746_s20, %s1379_s22 }
  0x6e   : > { %1083 = vmatprep.subr.bf16.mxu0 %v1082_v5  ;;  %v230_v16 = vld [vmem:[#allocation5 + $0x38] sm:$0xff]  ;;  %v1098_v17 = vpack.c.bf16 %v234_v15, %v233_v11  ;;  %v1102_v21 = vpack.c.bf16 %v236_v19, %v235_v18  ;;  %v237_v22 = vld [vmem:[#allocation5 + $0x70] sm:$0xff]  ;;  %v219_v25 = vld [vmem:[%s1663_s28 + $0x8] sm:$0xff]  ;;  %s1456_s5 = smov [#allocation8]  }
  0x6f   : > { %1095 = vmatprep.subr.bf16.mxu1 %v1094_v14  ;;  %v1090_v20 = vpack.c.bf16 %v230_v16, %v229_v13  ;;  %v238_v23 = vld [vmem:[#allocation5 + $0x78] sm:$0xff]  ;;  %v220_v26 = vld [vmem:[%s1663_s28 + $0x10] sm:$0xff]  ;;  %v239_v28 = vld [vmem:[#allocation5 + $0x80] sm:$0xff]  ;;  %p1381_p2 = pnand %p1380_p11, %p1810_p0  ;;  %s1383_s11 = sshll.u32 %s1456_s5, 4  ;;  %s1384_s11 = int_to_ptr.vmem [resolvable:$false] %s1383_s11 }
  0x70   : > { %1097 = vmatpush3.bf16.msra.mxu1 %v1094_v14  ;;  %v1106_v24 = vpack.c.bf16 %v238_v23, %v237_v22  ;;  %v221_v27 = vld [vmem:[%s1663_s28 + $0x18] sm:$0xff]  ;;  %v240_v29 = vld [vmem:[#allocation5 + $0x88] sm:$0xff]  ;;  %v241_v31 = vld [vmem:[#allocation5 + $0x90] sm:$0xff]  ;;  %s1385_s25 = scalar_lea.vmem %s1384_s11, 1024  ;;  %p1386_p7 = scmp.lt.s32.totalorder %s1746_s20, %s1384_s11 }
  0x71   : > { %1085 = vmatpush3.bf16.msra.mxu0 %v1082_v5  ;;  %1099 = vmatprep.subr.bf16.mxu1 %v1098_v17  ;;  %v1110_v30 = vpack.c.bf16 %v240_v29, %v239_v28  ;;  %v242_v32 = vld [vmem:[#allocation5 + $0x98] sm:$0xff]  ;;  %v243_v34 = vld [vmem:[#allocation5 + $0xa0] sm:$0xff]  ;;  %v244_v35 = vld [vmem:[#allocation5 + $0xa8] sm:$0xff]  ;;  %p1382_p3 = pneg %p1381_p2  ;;  %p1387_p9 = scmp.lt.s32.totalorder %s1385_s25, %s1379_s22 }
  0x72   : > { %1087 = vmatprep.subr.bf16.mxu0 %v1086_v12  ;;  %v1114_v33 = vpack.c.bf16 %v242_v32, %v241_v31  ;;  %v1118_v36 = vpack.c.bf16 %v244_v35, %v243_v34  ;;  %v245_v37 = vld [vmem:[#allocation5 + $0xb0] sm:$0xff]  ;;  %v246_v38 = vld [vmem:[#allocation5 + $0xb8] sm:$0xff]  ;;  %v247_v40 = vld [vmem:[#allocation5 + $0xc0] sm:$0xff] }
  0x73   : > { %v1122_v39 = vpack.c.bf16 %v246_v38, %v245_v37  ;;  %v248_v41 = vld [vmem:[#allocation5 + $0xc8] sm:$0xff]  ;;  %v249_v42 = vld [vmem:[#allocation5 + $0xd0] sm:$0xff]  ;;  %v250_v44 = vld [vmem:[#allocation5 + $0xd8] sm:$0xff]  ;;  %p1388_p12 = por %p1387_p9, %p1386_p7 }
  0x74   : > { %1101 = vmatpush3.bf16.msra.mxu1 %v1098_v17  ;;  %v1126_v43 = vpack.c.bf16 %v248_v41, %v247_v40  ;;  %v1130_v45 = vpack.c.bf16 %v250_v44, %v249_v42  ;;  %v251_v46 = vld [vmem:[#allocation5 + $0xe0] sm:$0xff]  ;;  %v252_v47 = vld [vmem:[#allocation5 + $0xe8] sm:$0xff]  ;;  %v253_v49 = vld [vmem:[#allocation5 + $0xf0] sm:$0xff]  ;;  %v401_v44 = vsub.s32 1, %v1681_v53 }
  0x75   : > { %1089 = vmatpush3.bf16.msra.mxu0 %v1086_v12  ;;  %1103 = vmatprep.subr.bf16.mxu1 %v1102_v21  ;;  %v1134_v48 = vpack.c.bf16 %v252_v47, %v251_v46  ;;  %v254_v50 = vld [vmem:[#allocation5 + $0xf8] sm:$0xff]  ;;  %v1684_v55 = vld [vmem:[#allocation7] sm:$0xff]  ;;  %v256_v15 = vld [vmem:[#allocation5 + $0x108] sm:$0xff]  ;;  %p1389_p1 = pnand %p1388_p12, %p1382_p3 }
  0x76   : > { %1091 = vmatprep.subr.bf16.mxu0 %v1090_v20  ;;  %v1138_v51 = vpack.c.bf16 %v254_v50, %v253_v49  ;;  %v286_v56 = vrot.slane %v1684_v55, %v285_v54  ;;  %v255_v14 = vld [vmem:[#allocation5 + $0x100] sm:$0xff]  ;;  %v257_v17 = vld [vmem:[#allocation5 + $0x110] sm:$0xff]  ;;  %v258_v18 = vld [vmem:[#allocation5 + $0x118] sm:$0xff] }
  0x77   : > { %v1142_v16 = vpack.c.bf16 %v256_v15, %v255_v14  ;;  %v1146_v19 = vpack.c.bf16 %v258_v18, %v257_v17  ;;  %v261_v23 = vld [vmem:[#allocation5 + $0x130] sm:$0xff]  ;;  %v267_v32 = vld [vmem:[#allocation5 + $0x160] sm:$0xff]  ;;  %v274_v42 = vld [vmem:[#allocation5 + $0x198] sm:$0xff] }
  0x78   : > { %1105 = vmatpush3.bf16.msra.mxu1 %v1102_v21  ;;  %v260_v21 = vld [vmem:[#allocation5 + $0x128] sm:$0xff]  ;;  %v265_v28 = vld [vmem:[#allocation5 + $0x150] sm:$0xff]  ;;  %v271_v38 = vld [vmem:[#allocation5 + $0x180] sm:$0xff] }
  0x79   : > { %1093 = vmatpush3.bf16.msra.mxu0 %v1090_v20  ;;  %1107 = vmatprep.subr.bf16.mxu1 %v1106_v24  ;;  %v259_v20 = vld [vmem:[#allocation5 + $0x120] sm:$0xff]  ;;  %v269_v35 = vld [vmem:[#allocation5 + $0x170] sm:$0xff] }
  0x7a   : > { %1127 = vmatprep.subr.bf16.mxu0 %v1126_v43  ;;  %v1150_v22 = vpack.c.bf16 %v260_v21, %v259_v20  ;;  %v273_v41 = vld [vmem:[#allocation5 + $0x190] sm:$0xff] }
  0x7c   : > { %959 = vmatmul.mubr.msk.f32.vlgmr.msra.gmra.mrb[0].mxu0 %vm287_vm0, %v219_v25  ;;  %1109 = vmatpush3.bf16.msra.mxu1 %v1106_v24  ;;  %v262_v24 = vld [vmem:[#allocation5 + $0x138] sm:$0xff] }
  0x7d   : > { %961 = vmatprep.mubr.msk.f32.mxu0 %vm287_vm0, %v220_v26  ;;  %1111 = vmatprep.subr.bf16.mxu1 %v1110_v30  ;;  %v1154_v25 = vpack.c.bf16 %v262_v24, %v261_v23  ;;  %v263_v26 = vld [vmem:[#allocation5 + $0x140] sm:$0xff] }
  0x7e   : > { %1129 = vmatpush3.bf16.msra.mxu0 %v1126_v43  ;;  %v1178_v43 = vpack.c.bf16 %v274_v42, %v273_v41 }
  0x7f   : > { %1131 = vmatprep.subr.bf16.mxu0 %v1130_v45 }
  0x80   : > { %962 = vmatmul.mubr.msk.f32.gmra.mrb[2].mxu0 %vm287_vm0, %v221_v27  ;;  %1113 = vmatpush3.bf16.msra.mxu1 %v1110_v30  ;;  %v264_v27 = vld [vmem:[#allocation5 + $0x148] sm:$0xff]  ;;  %v266_v30 = vld [vmem:[#allocation5 + $0x158] sm:$0xff] }
  0x81   : > { %1115 = vmatprep.subr.bf16.mxu1 %v1114_v33  ;;  %v1158_v29 = vpack.c.bf16 %v264_v27, %v263_v26  ;;  %v1162_v31 = vpack.c.bf16 %v266_v30, %v265_v28 }
  0x82   : > { %1133 = vmatpush3.bf16.msra.mxu0 %v1130_v45  ;;  %v402_v45 = vrot.slane %v1684_v55, %v401_v44 }
  0x83   : > { %1135 = vmatprep.subr.bf16.mxu0 %v1134_v48 }
  0x84   : > { %1117 = vmatpush3.bf16.msra.mxu1 %v1114_v33  ;;  %v268_v33 = vld [vmem:[#allocation5 + $0x168] sm:$0xff] }
  0x85   : > { %1119 = vmatprep.subr.bf16.mxu1 %v1118_v36  ;;  %v1166_v34 = vpack.c.bf16 %v268_v33, %v267_v32 }
  0x86   : > { %1137 = vmatpush3.bf16.msra.mxu0 %v1134_v48 }
  0x87   : > { %1139 = vmatprep.subr.bf16.mxu0 %v1138_v51 }
  0x88   : > { %1121 = vmatpush3.bf16.msra.mxu1 %v1118_v36  ;;  %v270_v36 = vld [vmem:[#allocation5 + $0x178] sm:$0xff] }
  0x89   : > { %1123 = vmatprep.subr.bf16.mxu1 %v1122_v39  ;;  %v1170_v37 = vpack.c.bf16 %v270_v36, %v269_v35 }
  0x8a   : > { %1141 = vmatpush3.bf16.msra.mxu0 %v1138_v51 }
  0x8b   : > { %1143 = vmatprep.subr.bf16.mxu0 %v1142_v16 }
  0x8c   : > { %1125 = vmatpush3.bf16.msra.mxu1 %v1122_v39  ;;  %v272_v39 = vld [vmem:[#allocation5 + $0x188] sm:$0xff] }
  0x8d   : > { %1159 = vmatprep.subr.bf16.mxu1 %v1158_v29  ;;  %v1174_v40 = vpack.c.bf16 %v272_v39, %v271_v38 }
  0x8e   : > { %1145 = vmatpush3.bf16.msra.mxu0 %v1142_v16 }
  0x8f   : > { %1147 = vmatprep.subr.bf16.mxu0 %v1146_v19 }
  0x92   : > { %1149 = vmatpush3.bf16.msra.mxu0 %v1146_v19 }
  0x93   : > { %1151 = vmatprep.subr.bf16.mxu0 %v1150_v22 }
  0x96   : > { %1153 = vmatpush3.bf16.msra.mxu0 %v1150_v22 }
  0x97   : > { %1155 = vmatprep.subr.bf16.mxu0 %v1154_v25 }
  0x9a   : > { %1157 = vmatpush3.bf16.msra.mxu0 %v1154_v25 }
 0x14f   : > { %v960_v57 = vpop.f32.mrb[0].mxu0 }
 0x150   : > { %v372_v58 = vadd.f32 %v960_v57, %v286_v56  ;;  %v366_v59 = vpop.f32.mrb[1].mxu0 }
 0x151   : > { %v367_v60 = vadd.f32 %v366_v59, %v286_v56 }
 0x152   : > { %1261 = vtanh.f32 %v372_v58  ;;  %v386_v5 = vmax.f32 %v372_v58, 0.0 }
 0x153   : > { %1263 = vtanh.f32 %v367_v60  ;;  %v963_v61 = vpop.f32.mrb[2].mxu0  ;;  %v385_v3 = vmax.f32 %v367_v60, 0.0 }
 0x154   : > { %v382_v62 = vadd.f32 %v963_v61, %v286_v56  ;;  %v376_v63 = vpop.f32.mrb[3].mxu0 }
 0x155   : > { %v377_v0 = vadd.f32 %v376_v63, %v286_v56 }
 0x156   : > { %1265 = vtanh.f32 %v382_v62  ;;  %v388_v11 = vmax.f32 %v382_v62, 0.0 }
 0x157   : > { %1267 = vtanh.f32 %v377_v0  ;;  %v387_v9 = vmax.f32 %v377_v0, 0.0 }
 0x15c   : > { %v1262_v2 = vpop.eup %1261 }
 0x15d   : > { %v1264_v4 = vpop.eup %1263  ;;  %v396_v7 = vsel %vm281_vm1, %v386_v5, %v1262_v2  ;;  %v275_v5 = vld [vmem:[#allocation5 + $0x1a0] sm:$0xff] }
 0x15e   : > { %v395_v6 = vsel %vm281_vm1, %v385_v3, %v1264_v4 }
 0x15f   : > { %996 = vmatprep.mubr.f32.mxu1 %v395_v6  ;;  %v276_v6 = vld [vmem:[#allocation5 + $0x1a8] sm:$0xff] }
 0x160   : > { %v1266_v8 = vpop.eup %1265  ;;  %997 = vmatmul.mubr.f32.vlgmr.msra.gmra.mrb[0].mxu1 %v396_v7  ;;  %v1182_v7 = vpack.c.bf16 %v276_v6, %v275_v5 }
 0x161   : > { %v1268_v10 = vpop.eup %1267  ;;  %v398_v13 = vsel %vm281_vm1, %v388_v11, %v1266_v8  ;;  %1161 = vmatpush3.bf16.msra.mxu1 %v1158_v29  ;;  %v277_v8 = vld [vmem:[#allocation5 + $0x1b0] sm:$0xff]  ;;  %v502_v11 = vsub.s32 2, %v1681_v53  ;;  %v599_v29 = vsub.s32 3, %v1681_v53 }
 0x162   : > { %v397_v12 = vsel %vm281_vm1, %v387_v9, %v1268_v10  ;;  %1163 = vmatprep.subr.bf16.mxu1 %v1162_v31  ;;  %v278_v9 = vld [vmem:[#allocation5 + $0x1b8] sm:$0xff] }
 0x163   : > { %999 = vmatprep.mubr.f32.mxu1 %v397_v12  ;;  %v1186_v10 = vpack.c.bf16 %v278_v9, %v277_v8  ;;  %v503_v12 = vrot.slane %v1684_v55, %v502_v11  ;;  %v600_v30 = vrot.slane %v1684_v55, %v599_v29 }
 0x164   : > { %1000 = vmatmul.mubr.f32.gmra.mrb[2].mxu1 %v398_v13 }
 0x165   : > { %1165 = vmatpush3.bf16.msra.mxu1 %v1162_v31 }
 0x166   : > { %1167 = vmatprep.subr.bf16.mxu1 %v1166_v34 }
 0x169   : > { %1169 = vmatpush3.bf16.msra.mxu1 %v1166_v34 }
 0x16a   : > { %1171 = vmatprep.subr.bf16.mxu1 %v1170_v37 }
 0x16d   : > { %1173 = vmatpush3.bf16.msra.mxu1 %v1170_v37 }
 0x16e   : > { %1175 = vmatprep.subr.bf16.mxu1 %v1174_v40 }
 0x171   : > { %1177 = vmatpush3.bf16.msra.mxu1 %v1174_v40 }
 0x172   : > { %1179 = vmatprep.subr.bf16.mxu1 %v1178_v43 }
 0x175   : > { %1181 = vmatpush3.bf16.msra.mxu1 %v1178_v43 }
 0x176   : > { %1183 = vmatprep.subr.bf16.mxu1 %v1182_v7 }
 0x179   : > { %1185 = vmatpush3.bf16.msra.mxu1 %v1182_v7 }
 0x17a   : > { %1187 = vmatprep.subr.bf16.mxu1 %v1186_v10 }
 0x17d   : > { %1189 = vmatpush3.bf16.msra.mxu1 %v1186_v10 }
 0x233   : > { %v998_v46 = vpop.f32.mrb[0].mxu1 }
 0x234   : > { %v475_v47 = vadd.f32 %v998_v46, %v402_v45  ;;  %v469_v48 = vpop.f32.mrb[1].mxu1 }
 0x235   : > { %v470_v49 = vadd.f32 %v469_v48, %v402_v45 }
 0x236   : > { %1269 = vtanh.f32 %v475_v47  ;;  %v489_v59 = vmax.f32 %v475_v47, 0.0 }
 0x237   : > { %1271 = vtanh.f32 %v470_v49  ;;  %v1001_v50 = vpop.f32.mrb[2].mxu1  ;;  %v488_v57 = vmax.f32 %v470_v49, 0.0 }
 0x238   : > { %v485_v51 = vadd.f32 %v1001_v50, %v402_v45  ;;  %v479_v52 = vpop.f32.mrb[3].mxu1 }
 0x239   : > { %v480_v54 = vadd.f32 %v479_v52, %v402_v45 }
 0x23a   : > { %1273 = vtanh.f32 %v485_v51  ;;  %v491_v2 = vmax.f32 %v485_v51, 0.0 }
 0x23b   : > { %1275 = vtanh.f32 %v480_v54  ;;  %v490_v63 = vmax.f32 %v480_v54, 0.0 }
 0x240   : > { %v1270_v56 = vpop.eup %1269 }
 0x241   : > { %v1272_v58 = vpop.eup %1271  ;;  %v497_v61 = vsel %vm281_vm1, %v489_v59, %v1270_v56 }
 0x242   : > { %v496_v60 = vsel %vm281_vm1, %v488_v57, %v1272_v58 }
 0x243   : > { %1034 = vmatprep.mubr.f32.mxu0 %v496_v60 }
 0x244   : > { %v1274_v62 = vpop.eup %1273  ;;  %1035 = vmatmul.mubr.f32.vlgmr.msra.gmra.mrb[4].mxu0 %v497_v61 }
 0x245   : > { %v1276_v0 = vpop.eup %1275  ;;  %v499_v4 = vsel %vm281_vm1, %v491_v2, %v1274_v62 }
 0x246   : > { %v498_v3 = vsel %vm281_vm1, %v490_v63, %v1276_v0 }
 0x247   : > { %1037 = vmatprep.mubr.f32.mxu0 %v498_v3 }
 0x248   : > { %1038 = vmatmul.mubr.f32.gmra.mrb[6].mxu0 %v499_v4 }
 0x317   : > { %v1036_v13 = vpop.f32.mrb[4].mxu0 }
 0x318   : > { %v576_v14 = vadd.f32 %v1036_v13, %v503_v12  ;;  %v570_v15 = vpop.f32.mrb[5].mxu0 }
 0x319   : > { %v571_v16 = vadd.f32 %v570_v15, %v503_v12 }
 0x31a   : > { %v590_v17 = vmax.f32 %v576_v14, 0.0 }
 0x31b   : > { %v589_v18 = vmax.f32 %v571_v16, 0.0  ;;  %v1039_v19 = vpop.f32.mrb[6].mxu0 }
 0x31c   : > { %v586_v20 = vadd.f32 %v1039_v19, %v503_v12  ;;  %v580_v21 = vpop.f32.mrb[7].mxu0  ;;  %v594_v24 = vsel %vm281_vm1, %v590_v17, %v576_v14 }
 0x31d   : > { %v581_v22 = vadd.f32 %v580_v21, %v503_v12  ;;  %v593_v23 = vsel %vm281_vm1, %v589_v18, %v571_v16 }
 0x31e   : > { %v592_v25 = vmax.f32 %v586_v20, 0.0  ;;  %1072 = vmatprep.mubr.f32.mxu1 %v593_v23 }
 0x31f   : > { %v591_v26 = vmax.f32 %v581_v22, 0.0  ;;  %1073 = vmatmul.mubr.f32.vlgmr.msra.gmra.mrb[4].mxu1 %v594_v24 }
 0x320   : > { %v596_v28 = vsel %vm281_vm1, %v592_v25, %v586_v20 }
 0x321   : > { %v595_v27 = vsel %vm281_vm1, %v591_v26, %v581_v22 }
 0x322   : > { %1075 = vmatprep.mubr.f32.mxu1 %v595_v27 }
 0x323   : > { %1076 = vmatmul.mubr.f32.gmra.mrb[6].mxu1 %v596_v28 }
 0x3f2   : > { %v1074_v31 = vpop.f32.mrb[4].mxu1 }
 0x3f3   : > { %v667_v32 = vpop.f32.mrb[5].mxu1  ;;  %v673_v34 = vadd.f32 %v1074_v31, %v600_v30 }
 0x3f4   : > { %v668_v33 = vadd.f32 %v667_v32, %v600_v30 }
 0x3f5   : > { %v689_v55 = vsel %vm282_vm2, %v673_v34, -1e+30 }
 0x3f6   : > { %v1077_v35 = vpop.f32.mrb[6].mxu1  ;;  %v688_v36 = vsel %vm282_vm2, %v668_v33, -1e+30 }
 0x3f7   : > { %v677_v37 = vpop.f32.mrb[7].mxu1  ;;  %692 = vmax.xlane.f32.xlu0 %v688_v36  ;;  %v1723_v39 = vadd.f32 %v1077_v35, %v600_v30 }
 0x3f8   : > { %v678_v38 = vadd.f32 %v677_v37, %v600_v30 }
 0x3f9   : > { %v691_v40 = vsel %vm282_vm2, %v1723_v39, -1e+30 }
 0x3fa   : > { %v690_v53 = vsel %vm282_vm2, %v678_v38, -1e+30 }
 0x3fb   : > { %696 = vmax.xlane.f32.xlu1 %v690_v53  ;;  %694 = vmax.xlane.f32.xlu0 %v689_v55 }
 0x3ff   : > { %698 = vmax.xlane.f32.xlu1 %v691_v40 }
 0x484   : > { %v693_v41 = vpop.xlane.xlu0 %692 }
 0x485   : > { %v700_v42 = vsub.f32 %v688_v36, %v693_v41 }
 0x487   : > { %v704_v43 = vmul.f32 1.442695, %v700_v42 }
 0x488   : > { %v697_v44 = vpop.xlane.xlu1 %696  ;;  %v695_v45 = vpop.xlane.xlu0 %694 }
 0x489   : > { %1277 = vpow2.f32 %v704_v43  ;;  %v702_v46 = vsub.f32 %v690_v53, %v697_v44  ;;  %v701_v47 = vsub.f32 %v689_v55, %v695_v45 }
 0x48b   : > { %v708_v48 = vmul.f32 1.442695, %v702_v46  ;;  %v706_v49 = vmul.f32 1.442695, %v701_v47 }
 0x48c   : > { %v699_v50 = vpop.xlane.xlu1 %698 }
 0x48d   : > { %1279 = vpow2.f32 %v708_v48  ;;  %v703_v51 = vsub.f32 %v691_v40, %v699_v50 }
 0x48e   : > { %1281 = vpow2.f32 %v706_v49 }
 0x48f   : > { %v710_v52 = vmul.f32 1.442695, %v703_v51 }
 0x491   : > { %1283 = vpow2.f32 %v710_v52 }
 0x493   : > { %v1278_v54 = vpop.eup %1277 }
 0x494   : > { %712 = vadd.xlane.f32.xlu0 %v1278_v54 }
 0x497   : > { %v1280_v56 = vpop.eup %1279 }
 0x498   : > { %v1282_v57 = vpop.eup %1281  ;;  %716 = vadd.xlane.f32.xlu0 %v1280_v56 }
 0x499   : > { %714 = vadd.xlane.f32.xlu1 %v1282_v57 }
 0x49b   : > { %v1284_v58 = vpop.eup %1283 }
 0x49d   : > { %718 = vadd.xlane.f32.xlu1 %v1284_v58 }
 0x521   : > { %v713_v59 = vpop.xlane.xlu0 %712 }
 0x522   : > { %1285 = vlog2.f32 %v713_v59 }
 0x525   : > { %v717_v60 = vpop.xlane.xlu0 %716 }
 0x526   : > { %v715_v61 = vpop.xlane.xlu1 %714  ;;  %1287 = vlog2.f32 %v717_v60 }
 0x527   : > { %1289 = vlog2.f32 %v715_v61 }
 0x52a   : > { %v719_v62 = vpop.xlane.xlu1 %718 }
 0x52b   : > { %1291 = vlog2.f32 %v719_v62 }
 0x52c   : > { %v1286_v63 = vpop.eup %1285 }
 0x52d   : > { %v721_v0 = vmul.f32 0.6931472, %v1286_v63 }
 0x52f   : > { %v728_v2 = vsub.f32 %v700_v42, %v721_v0 }
 0x530   : > { %v1288_v3 = vpop.eup %1287 }
 0x531   : > { %v1290_v4 = vpop.eup %1289  ;;  %v732_v5 = vsel %vm282_vm2, %v728_v2, %v668_v33  ;;  %v725_v6 = vmul.f32 0.6931472, %v1288_v3 }
 0x532   : > { %736 = vst [vmem:[%s215_s18] sm:$0xff] %v732_v5  ;;  %v723_v7 = vmul.f32 0.6931472, %v1290_v4 }
 0x533   : > { %v730_v8 = vsub.f32 %v702_v46, %v725_v6 }
 0x534   : > { %v729_v9 = vsub.f32 %v701_v47, %v723_v7 }
 0x535   : > { %v1292_v10 = vpop.eup %1291  ;;  %v734_v11 = vsel %vm282_vm2, %v730_v8, %v678_v38 }
 0x536   : > { %v733_v12 = vsel %vm282_vm2, %v729_v9, %v673_v34  ;;  %738 = vst [vmem:[%s215_s18 + $0x10] sm:$0xff] %v734_v11  ;;  %v727_v13 = vmul.f32 0.6931472, %v1292_v10 }
 0x537   : > { %737 = vst [vmem:[%s215_s18 + $0x8] sm:$0xff] %v733_v12 }
 0x538   : > { %v731_v14 = vsub.f32 %v703_v51, %v727_v13 }
 0x53a   : > { %v735_v15 = vsel %vm282_vm2, %v731_v14, %v1723_v39 }
 0x53b   : > { %739 = vst [vmem:[%s215_s18 + $0x18] sm:$0xff] %v735_v15 }
 0x53c   : > { %1392 = shalt.err (!%p1389_p1)
}
 0x53d   : > { %s1393_s10 = scalar_lea.hbm %s1744_s27, 512  ;;  %s1397_s26 = scalar_lea.hbm %s1796_s3, 1024 }
 0x53e   : > { %p1394_p13 = scmp.ne.s32.totalorder %s1744_s27, %s1393_s10  ;;  %p1398_p4 = scmp.lt.u32.totalorder %s1744_s27, %s1796_s3 }
 0x53f   : > { %p1399_p5 = scmp.lt.u32.totalorder %s1397_s26, %s1393_s10  ;;  %p1401_p11 = scmp.lt.u32.totalorder %s1393_s10, %s1744_s27 }
 0x540   : > { %p1395_p6 = pnand %p1394_p13, %p1810_p0 }
 0x541   : > { %p1400_p8 = por %p1399_p5, %p1398_p4 }
 0x542   : > { %p1396_p10 = pneg %p1395_p6 }
 0x543   : > { %p1402_p2 = por %p1401_p11, %p1400_p8 }
 0x545   : > { %p1403_p3 = pnand %p1402_p2, %p1396_p10 }
 0x547   : > { %1406 = shalt.err (!%p1403_p3)
}
 0x548   : > { %s1457_s28 = smov 128   ;;  %s1458_s18 = smov 8  }
 0x549   : > { %1200 = dma.vmem_to_hbm [thread:$0]  (%p1810_p0), %s1746_s20, 512, %s1744_s27, %s741_s16, %s1457_s28, %s1457_s28, %s1458_s18  }
 0x54a PF: > { %s769_s7 = sand.u32 1, %s1437_s12   ;;  %p1811_p7 = scmp.ne.s32.totalorder %s1801_s19, 0 }
 0x54b   : > { %p1812_p9 = scmp.ge.s32.totalorder %s1449_s15, 2  ;;  %s770_s8 = scalar_lea.sflag [#allocation4], %s769_s7 }
 0x54d   : > { %p1214_p12 = pnand %p1812_p9, %p1811_p7 }
 0x54f   : > { %1432 = dma.done.wait (!%p1214_p12), %s770_s8, 512  }
 0x550   : > { %1434 = vsyncadd (!%p1214_p12), %s770_s8, 4294966784  ;;  %p17_p1 = scmp.ge.s32.totalorder %s1592_s4, 4   ;;  %s1813_s12 = smov %s1441_s13 }
 0x551   : > { %s1814_s13 = smov %s1445_s14  ;;  %s1815_s14 = smov %s1608_s9 }
 0x552   : > { %s1816_s15 = smov %s1592_s4  ;;  %19 = sbr.rel (!%p17_p1) target bundleno = 6 (0x6), region = 85 }
 0x559   :  { %775 = vsyncpa [#allocation3], 1 }
 0x55a   :  { %777 = vsyncpa [#allocation3 + $0x1], 1 }
 0x55b   :  { %778 = vsyncpa [#allocation6], 1 }
 0x55c   :  { %779 = vsyncpa [#allocation4], 1 }
 0x55d   :  { %781 = vsyncpa [#allocation4 + $0x1], 1 }

</bundles_post_ra>
